<compile_context>
chip_gen: v7x
topology: tpu7x:2x2x1
jax: 0.10.0
libtpu: 0.0.40
codegen_flags: <defaults>
</compile_context>

<pallas_src>
import jax
import jax.numpy as jnp
from jax.experimental import pallas as pl
from jax.experimental.pallas import tpu as pltpu

HIDDEN = 32
_LANE = 128
_MAX_TILE_N = 2048


def _round_up(a, b):
    return (a + b - 1) // b * b


def _choose_tiling(n):
    """Pick a lane-aligned node tile and the padded node count."""
    n128 = _round_up(n, _LANE)
    tile_n = min(_MAX_TILE_N, n128)
    # Prefer >= 2 grid steps when there is enough work so the 'parallel' grid
    # axis can be split across the two TensorCores on v7x.
    if n128 >= 2 * _LANE and n128 // tile_n < 2:
        tile_n = _round_up((n128 + 1) // 2, _LANE)
    n_pad = _round_up(n128, tile_n)
    return tile_n, n_pad


def _rgcn_kernel(xt_ref, wx_ref, bg_ref, wlt_ref, bl_ref, out_ref):
    # xt_ref: (F, tile_n) -- nodes live on the lane axis.
    xt = xt_ref[...]
    # Fused gate pre-activations: one MXU call for both gates -> (64, tile_n).
    g = (jnp.dot(wx_ref[...], xt, preferred_element_type=jnp.float32)
         + bg_ref[...])
    z = jax.nn.sigmoid(g[:HIDDEN, :])          # update gate      (32, tile_n)
    h_tilde = jnp.tanh(g[HIDDEN:, :])          # candidate state  (32, tile_n)
    # H0 == 0  =>  reset gate is irrelevant and z * H0 vanishes.
    h_new = (1.0 - z) * h_tilde
    h_relu = jnp.maximum(h_new, 0.0)
    # Linear(32 -> 1) as (1, 32) @ (32, tile_n): lane-dense (1, tile_n) output.
    out_ref[...] = (jnp.dot(wlt_ref[...], h_relu,
                            preferred_element_type=jnp.float32)
                    + bl_ref[...])


def recurrent_gcn_forward(x, edge_index, edge_weight, params):
    """Fused forward of RecurrentGCN.  edge_index/edge_weight unused for K=1
    diffusion convolution (exactly matching the PyTorch DConv(K=1) semantics)."""
    del edge_index, edge_weight  # no-op for K=1 diffusion convolution
    n, f = x.shape
    tile_n, n_pad = _choose_tiling(n)

    # Node-major -> feature-major; zero-pad the node (lane) axis to the tile.
    xt = jnp.zeros((f, n_pad), jnp.float32).at[:, :n].set(
        x.T.astype(jnp.float32))

    # Fused / transposed parameters for the kernel (only the X-side gate
    # weights matter because the initial hidden state is zero).
    w_x = jnp.concatenate([params["wzx"].T, params["whx"].T], axis=0)   # (64,F)
    b_g = jnp.concatenate([params["bz"].T, params["bh"].T], axis=0)     # (64,1)
    wl_t = params["wl"].T                                               # (1,32)
    bl = params["bl"]                                                   # (1,1)

    grid = (n_pad // tile_n,)
    rep = lambda i: (0, 0)

    out_t = pl.pallas_call(
        _rgcn_kernel,
        out_shape=jax.ShapeDtypeStruct((1, n_pad), jnp.float32),
        grid=grid,
        in_specs=[
            pl.BlockSpec((f, tile_n), lambda i: (0, i)),   # X^T node tile
            pl.BlockSpec(w_x.shape, rep),                  # fused gate weights
            pl.BlockSpec(b_g.shape, rep),                  # fused gate biases
            pl.BlockSpec(wl_t.shape, rep),                 # linear weight
            pl.BlockSpec(bl.shape, rep),                   # linear bias
        ],
        out_specs=pl.BlockSpec((1, tile_n), lambda i: (0, i)),
        compiler_params=pltpu.CompilerParams(
            dimension_semantics=("parallel",)),
    )(xt, w_x, b_g, wl_t, bl)

    return out_t[0, :n, None]   # back to (N, 1)


def make_params(key, node_features):
    """Deterministic parameter init.

    Each DConv(K=1) weight is (2, 1, in, out); since the forward uses
    W[0,0] + W[1,0] on the same input, we materialize the combined (in, out)
    matrix and split it into the X-part and H-part of concat([X, H]).
    """
    f, h = node_features, HIDDEN
    keys = jax.random.split(key, 8)
    s = 0.1

    def gate(kw):
        w = s * jax.random.normal(kw, (f + h, h), jnp.float32)
        return w[:f], w[f:]

    wzx, wzh = gate(keys[0])
    wrx, wrh = gate(keys[1])
    whx, whh = gate(keys[2])
    bz = s * jax.random.normal(keys[3], (1, h), jnp.float32)
    br = s * jax.random.normal(keys[4], (1, h), jnp.float32)
    bh = s * jax.random.normal(keys[5], (1, h), jnp.float32)
    wl = s * jax.random.normal(keys[6], (h, 1), jnp.float32)
    bl = s * jax.random.normal(keys[7], (1, 1), jnp.float32)
    return dict(wzx=wzx, wzh=wzh, bz=bz, wrx=wrx, wrh=wrh, br=br,
                whx=whx, whh=whh, bh=bh, wl=wl, bl=bl)


def reference_forward(x, params):
    """Pure-JAX reference mirroring the PyTorch forward (H0 = 0, K = 1)."""
    h = jnp.zeros((x.shape[0], HIDDEN), jnp.float32)
    z = jax.nn.sigmoid(x @ params["wzx"] + h @ params["wzh"] + params["bz"])
    r = jax.nn.sigmoid(x @ params["wrx"] + h @ params["wrh"] + params["br"])
    h_tilde = jnp.tanh(x @ params["whx"] + (h * r) @ params["whh"]
                       + params["bh"])
    h_new = z * h + (1.0 - z) * h_tilde
    h_relu = jnp.maximum(h_new, 0.0)
    return h_relu @ params["wl"] + params["bl"]


if __name__ == "__main__":
    node_features = 4
    num_edges = 32

    key = jax.random.PRNGKey(0)
    kx, kei, kew, kp = jax.random.split(key, 4)
    params = make_params(kp, node_features)

    # Small case (single grid step) and a ragged case (multi-step grid + tail
    # padding) to exercise the cdiv/padded tiling path.
    for num_nodes in (16, 300):
        kxn = jax.random.fold_in(kx, num_nodes)
        x = jax.random.normal(kxn, (num_nodes, node_features), jnp.float32)
        edge_index = jax.random.randint(kei, (2, num_edges), 0, num_nodes,
                                        dtype=jnp.int32)
        edge_weight = jax.random.uniform(kew, (num_edges,), jnp.float32) + 0.1

        out = recurrent_gcn_forward(x, edge_index, edge_weight, params)
        out = jax.block_until_ready(out)

        ref = reference_forward(x, params)
        assert out.shape == (num_nodes, 1)
        assert jnp.allclose(out, ref, atol=1e-5, rtol=1e-5)

    print("KERNEL_OK")
</pallas_src>

<mosaic_0001>
module attributes {stable_mosaic.version = 11 : i64} {
  func.func @_rgcn_kernel(%arg0: i32, %arg1: memref<4x128xf32, #tpu.memory_space<vmem>>, %arg2: memref<64x4xf32, #tpu.memory_space<vmem>>, %arg3: memref<64x1xf32, #tpu.memory_space<vmem>>, %arg4: memref<1x32xf32, #tpu.memory_space<vmem>>, %arg5: memref<1x1xf32, #tpu.memory_space<vmem>>, %arg6: memref<1x128xf32, #tpu.memory_space<vmem>>) attributes {dimension_semantics = [#tpu.dimension_semantics<parallel>], iteration_bounds = array<i64: 1>, scalar_prefetch = 0 : i64, scratch_operands = 0 : i64, tpu.core_type = #tpu.core_type<tc>, window_params = [{transform_indices = @transform_0, window_bounds = array<i64: 4, 128>}, {pipeline_mode = #tpu.pipeline_mode<synchronous>, transform_indices = @transform_1, window_bounds = array<i64: 64, 4>}, {pipeline_mode = #tpu.pipeline_mode<synchronous>, transform_indices = @transform_2, window_bounds = array<i64: 64, 1>}, {pipeline_mode = #tpu.pipeline_mode<synchronous>, transform_indices = @transform_3, window_bounds = array<i64: 1, 32>}, {pipeline_mode = #tpu.pipeline_mode<synchronous>, transform_indices = @transform_4, window_bounds = array<i64: 1, 1>}, {transform_indices = @transform_5, window_bounds = array<i64: 1, 128>}]} {
    %c0 = arith.constant 0 : index
    %c0_0 = arith.constant 0 : index
    %0 = vector.load %arg1[%c0, %c0_0] : memref<4x128xf32, #tpu.memory_space<vmem>>, vector<4x128xf32>
    %c0_1 = arith.constant 0 : index
    %c0_2 = arith.constant 0 : index
    %1 = vector.load %arg2[%c0_1, %c0_2] : memref<64x4xf32, #tpu.memory_space<vmem>>, vector<64x4xf32>
    %cst = arith.constant dense<0.000000e+00> : vector<64x128xf32>
    %2 = tpu.matmul %1, %0, %cst {dimension_numbers = #tpu.dot_dimension_numbers<[1], [0], [0], [1], [0, 0, 1, 1], [], []>} : vector<64x4xf32>, vector<4x128xf32>, vector<64x128xf32> -> vector<64x128xf32>
    %c0_3 = arith.constant 0 : index
    %c0_4 = arith.constant 0 : index
    %3 = vector.load %arg3[%c0_3, %c0_4] : memref<64x1xf32, #tpu.memory_space<vmem>>, vector<64x1xf32>
    %4 = vector.broadcast %3 : vector<64x1xf32> to vector<64x128xf32>
    %5 = arith.addf %2, %4 : vector<64x128xf32>
    %6 = vector.extract_strided_slice %5 {offsets = [0, 0], sizes = [32, 128], strides = [1, 1]} : vector<64x128xf32> to vector<32x128xf32>
    %7 = arith.negf %6 : vector<32x128xf32>
    %8 = math.exp %7 : vector<32x128xf32>
    %cst_5 = arith.constant 1.000000e+00 : f32
    %9 = vector.broadcast %cst_5 : f32 to vector<32x128xf32>
    %10 = arith.addf %9, %8 : vector<32x128xf32>
    %11 = arith.divf %9, %10 : vector<32x128xf32>
    %12 = vector.extract_strided_slice %5 {offsets = [32, 0], sizes = [32, 128], strides = [1, 1]} : vector<64x128xf32> to vector<32x128xf32>
    %13 = math.tanh %12 : vector<32x128xf32>
    %cst_6 = arith.constant 1.000000e+00 : f32
    %14 = vector.broadcast %cst_6 : f32 to vector<32x128xf32>
    %15 = arith.subf %14, %11 : vector<32x128xf32>
    %16 = arith.mulf %15, %13 : vector<32x128xf32>
    %cst_7 = arith.constant 0.000000e+00 : f32
    %17 = vector.broadcast %cst_7 : f32 to vector<32x128xf32>
    %18 = arith.maximumf %16, %17 : vector<32x128xf32>
    %c0_8 = arith.constant 0 : index
    %c0_9 = arith.constant 0 : index
    %19 = vector.load %arg4[%c0_8, %c0_9] : memref<1x32xf32, #tpu.memory_space<vmem>>, vector<1x32xf32>
    %cst_10 = arith.constant dense<0.000000e+00> : vector<1x128xf32>
    %20 = tpu.matmul %19, %18, %cst_10 {dimension_numbers = #tpu.dot_dimension_numbers<[1], [0], [0], [1], [0, 0, 1, 1], [], []>} : vector<1x32xf32>, vector<32x128xf32>, vector<1x128xf32> -> vector<1x128xf32>
    %c0_11 = arith.constant 0 : index
    %c0_12 = arith.constant 0 : index
    %21 = vector.load %arg5[%c0_11, %c0_12] : memref<1x1xf32, #tpu.memory_space<vmem>>, vector<1x1xf32>
    %22 = vector.broadcast %21 : vector<1x1xf32> to vector<1x128xf32>
    %23 = arith.addf %20, %22 : vector<1x128xf32>
    %c0_13 = arith.constant 0 : index
    %c0_14 = arith.constant 0 : index
    %24 = vector.load %arg6[%c0_13, %c0_14] : memref<1x128xf32, #tpu.memory_space<vmem>>, vector<1x128xf32>
    tpu.vector_store %arg6[%c0_13, %c0_14], %23 {strides = array<i32>} : memref<1x128xf32, #tpu.memory_space<vmem>>, vector<1x128xf32>,
    return
  }
  func.func @transform_0(%arg0: i32) -> (i32, i32) {
    %c0_i32 = arith.constant 0 : i32
    %c0_i32_0 = arith.constant 0 : i32
    return %c0_i32, %arg0 : i32, i32
  }
  func.func @transform_1(%arg0: i32) -> (i32, i32) {
    %c0_i32 = arith.constant 0 : i32
    %c0_i32_0 = arith.constant 0 : i32
    %c0_i32_1 = arith.constant 0 : i32
    return %c0_i32, %c0_i32_0 : i32, i32
  }
  func.func @transform_2(%arg0: i32) -> (i32, i32) {
    %c0_i32 = arith.constant 0 : i32
    %c0_i32_0 = arith.constant 0 : i32
    %c0_i32_1 = arith.constant 0 : i32
    return %c0_i32, %c0_i32_0 : i32, i32
  }
  func.func @transform_3(%arg0: i32) -> (i32, i32) {
    %c0_i32 = arith.constant 0 : i32
    %c0_i32_0 = arith.constant 0 : i32
    %c0_i32_1 = arith.constant 0 : i32
    return %c0_i32, %c0_i32_0 : i32, i32
  }
  func.func @transform_4(%arg0: i32) -> (i32, i32) {
    %c0_i32 = arith.constant 0 : i32
    %c0_i32_0 = arith.constant 0 : i32
    %c0_i32_1 = arith.constant 0 : i32
    return %c0_i32, %c0_i32_0 : i32, i32
  }
  func.func @transform_5(%arg0: i32) -> (i32, i32) {
    %c0_i32 = arith.constant 0 : i32
    %c0_i32_0 = arith.constant 0 : i32
    return %c0_i32, %arg0 : i32, i32
  }
}

</mosaic_0001>

<bundles_post_ra>
// kernel: tpu_custom_call.1
= control target key start
LH: loop header
LB: loop body
LE: loop exit
PB: predicated region body
PF: predicated region fallthrough
CT: control target
= control target key end

     0   :  { %s582_s0 = inlined_call_operand.vmem [shape: f32[4,128], index: 0, kind: input, shape index: {}]   ;;  %s583_s1 = inlined_call_operand.vmem [shape: f32[64,4], index: 1, kind: input, shape index: {}]   ;;  %s584_s2 = inlined_call_operand.vmem [shape: f32[64,1], index: 2, kind: input, shape index: {}]   ;;  %s585_s3 = inlined_call_operand.vmem [shape: f32[1,32], index: 3, kind: input, shape index: {}]   ;;  %s586_s4 = inlined_call_operand.<no memory space> [shape: f32[1,1], index: 4, kind: input, shape index: {}]   ;;  %s587_s5 = inlined_call_operand.hbm [shape: f32[1,128], index: 5, kind: output, shape index: {}]  }
   0x1   :  { %v10_v0 = vstv %s586_s4 }
   0x2   :  { %11 = vst [vmem:[#allocation2] sm:$0x1] %v10_v0 }
   0x3   :  { %v23_v1 = vld [vmem:[%s582_s0] sm:$0xf]  ;;  %vm105_vm0 = vcmask 1043456   ;;  %vm80_vm1 = vcmask 31744   ;;  %v25_v3 = vld [vmem:[%s583_s1 + $0x8] sm:$0xff]  ;;  %v26_v4 = vld [vmem:[%s583_s1 + $0x10] sm:$0xff] }
   0x4   :  { %v24_v2 = vld [vmem:[%s583_s1] sm:$0xff]  ;;  %382 = vmatprep.subr.msk.mxu0 %vm105_vm0, %v23_v1  ;;  %v468_v5 = vmov 0   ;;  %v34_v7 = vld [vmem:[%s584_s2 + $0x10] sm:$0xff]  ;;  %v27_v8 = vld [vmem:[%s583_s1 + $0x18] sm:$0xff] }
   0x5   :  { %384 = vmatprep.mubr.msk.f32.mxu0 %vm80_vm1, %v24_v2  ;;  %383 = vmatpush3.msk.msra.mxu0 %vm105_vm0, %v23_v1  ;;  %v32_v6 = vld [vmem:[%s584_s2] sm:$0xff]  ;;  %v33_v10 = vld [vmem:[%s584_s2 + $0x8] sm:$0xff]  ;;  %v35_v11 = vld [vmem:[%s584_s2 + $0x18] sm:$0xff] }
   0x6   :  { %418 = vset.pattern.permute.xlu0 %v468_v5  ;;  %385 = vmatmul.mubr.msk.f32.vlgmr.msra.gmra.mrb[0].mxu0 %vm80_vm1, %v25_v3  ;;  %v28_v9 = vld [vmem:[%s583_s1 + $0x20] sm:$0xff] }
   0x7   :  { %419 = vset.pattern.permute.xlu1 %v468_v5  ;;  %387 = vmatprep.mubr.msk.f32.mxu0 %vm80_vm1, %v26_v4 }
   0x8   :  { %42 = vperm.xlu0 %418, %v32_v6   ;;  %52 = vperm.xlu1 %419, %v34_v7  }
   0x9   :  { %12 = vsyncpa [#allocation4], 0  ;;  %v29_v12 = vld [vmem:[%s583_s1 + $0x28] sm:$0xff]  ;;  %v30_v13 = vld [vmem:[%s583_s1 + $0x30] sm:$0xff]  ;;  %v469_v20 = vmov 0.0|0.0   ;;  %vm470_vm2 = vmmov 0  }
   0xa   :  { %388 = vmatmul.mubr.msk.f32.gmra.mrb[2].mxu0 %vm80_vm1, %v27_v8  ;;  %v36_v14 = vld [vmem:[%s584_s2 + $0x20] sm:$0xff]  ;;  %v37_v15 = vld [vmem:[%s584_s2 + $0x28] sm:$0xff]  ;;  %v31_v16 = vld [vmem:[%s583_s1 + $0x38] sm:$0xff]  ;;  %407 = vmatprep.subr.bf16.mxu1 %v469_v20  ;;  %v471_v21 = vmov 0.0   ;;  %vm265_vm3 = vcmask 261120   ;;  %s472_s4 = smov [#allocation3]  }
   0xb   :  { %390 = vmatprep.mubr.msk.f32.mxu0 %vm80_vm1, %v28_v9  ;;  %v38_v17 = vld [vmem:[%s584_s2 + $0x30] sm:$0xff]  ;;  %v39_v18 = vld [vmem:[%s584_s2 + $0x38] sm:$0xff]  ;;  %v255_v19 = vld [vmem:[#allocation2] sm:$0x1]  ;;  %404 = vmatprep.mubr.msk.f32.mxu1 %vm470_vm2, %v471_v21  ;;  %s346_s0 = sshll.u32 %s472_s4, 4  ;;  %s347_s0 = int_to_ptr.vmem [resolvable:$true] %s346_s0 }
   0xc   :  { %47 = vperm.xlu0 %418, %v33_v10   ;;  %57 = vperm.xlu1 %419, %v35_v11   ;;  %s444_s27 = scalar_lea.vmem %s347_s0, 16  ;;  %s448_s28 = scalar_lea.vmem %s347_s0, 32 }
   0xd   :  { %p445_p0 = scmp.ne.s32.totalorder %s347_s0, %s444_s27  ;;  %p449_p1 = scmp.lt.s32.totalorder %s347_s0, %s347_s0 }
   0xe   :  { %391 = vmatmul.mubr.msk.f32.gmra.mrb[4].mxu0 %vm80_vm1, %v29_v12  ;;  %p450_p2 = scmp.lt.s32.totalorder %s448_s28, %s444_s27 }
   0xf   :  { %393 = vmatprep.mubr.msk.f32.mxu0 %vm80_vm1, %v30_v13 }
  0x10   :  { %62 = vperm.xlu0 %418, %v36_v14   ;;  %67 = vperm.xlu1 %419, %v37_v15   ;;  %p451_p3 = por %p450_p2, %p449_p1 }
  0x12   :  { %394 = vmatmul.mubr.msk.f32.gmra.mrb[6].mxu0 %vm80_vm1, %v31_v16  ;;  %v254_v16 = vld [vmem:[%s585_s3] sm:$0x1]  ;;  %p452_p4 = pnand %p451_p3, %p445_p0 }
  0x14   :  { %72 = vperm.xlu0 %418, %v38_v17   ;;  %77 = vperm.xlu1 %419, %v39_v18   ;;  %v261_v17 = vlaneseq }
  0x16   :  { %v262_v18 = vshrl.u32 %v261_v17, 7 }
  0x18   :  { %258 = vperm.xlu0 %418, %v255_v19   ;;  %v263_v19 = vsub.s32 0, %v262_v18 }
  0x87   :  { %v43_v22 = vpop.permute.xlu0 %42  ;;  %v53_v23 = vpop.permute.xlu1 %52 }
  0x8b   :  { %v48_v24 = vpop.permute.xlu0 %47  ;;  %v58_v30 = vpop.permute.xlu1 %57 }
  0x8f   :  { %v68_v41 = vpop.permute.xlu1 %67  ;;  %v63_v43 = vpop.permute.xlu0 %62 }
  0x93   :  { %v78_v51 = vpop.permute.xlu1 %77  ;;  %v73_v53 = vpop.permute.xlu0 %72 }
  0x97   :  { %v259_v21 = vpop.permute.xlu0 %258 }
  0xd9   :  { %v386_v25 = vpop.f32.mrb[0].mxu0 }
  0xda   :  { %v181_v26 = vadd.f32 %v386_v25, %v48_v24  ;;  %v175_v27 = vpop.f32.mrb[1].mxu0 }
  0xdb   :  { %v176_v28 = vadd.f32 %v175_v27, %v43_v22  ;;  %v264_v22 = vrot.slane %v259_v21, %v263_v19 }
  0xdc   :  { %v364_v29 = vmul.f32 -1.442695, %v181_v26 }
  0xdd   :  { %v363_v31 = vmul.f32 -1.442695, %v176_v28  ;;  %v389_v32 = vpop.f32.mrb[2].mxu0 }
  0xde   :  { %420 = vpow2.f32 %v364_v29  ;;  %v191_v33 = vadd.f32 %v389_v32, %v58_v30  ;;  %v185_v34 = vpop.f32.mrb[3].mxu0 }
  0xdf   :  { %422 = vpow2.f32 %v363_v31  ;;  %v186_v35 = vadd.f32 %v185_v34, %v53_v23 }
  0xe0   :  { %v366_v36 = vmul.f32 -1.442695, %v191_v33 }
  0xe1   :  { %v365_v37 = vmul.f32 -1.442695, %v186_v35  ;;  %v392_v38 = vpop.f32.mrb[4].mxu0 }
  0xe2   :  { %424 = vpow2.f32 %v366_v36  ;;  %v195_v39 = vpop.f32.mrb[5].mxu0  ;;  %v201_v47 = vadd.f32 %v392_v38, %v68_v41 }
  0xe3   :  { %426 = vpow2.f32 %v365_v37  ;;  %v196_v49 = vadd.f32 %v195_v39, %v63_v43 }
  0xe5   :  { %v395_v40 = vpop.f32.mrb[6].mxu0 }
  0xe6   :  { %v205_v42 = vpop.f32.mrb[7].mxu0  ;;  %v211_v55 = vadd.f32 %v395_v40, %v78_v51 }
  0xe7   :  { %v206_v57 = vadd.f32 %v205_v42, %v73_v53 }
  0xe8   :  { %v421_v44 = vpop.eup %420 }
  0xe9   :  { %v423_v45 = vpop.eup %422  ;;  %v227_v46 = vadd.f32 1.0, %v421_v44 }
  0xea   :  { %v226_v48 = vadd.f32 1.0, %v423_v45 }
  0xeb   :  { %428 = vrcp.f32 %v227_v46 }
  0xec   :  { %v425_v50 = vpop.eup %424  ;;  %430 = vrcp.f32 %v226_v48 }
  0xed   :  { %v427_v52 = vpop.eup %426  ;;  %v229_v54 = vadd.f32 1.0, %v425_v50  ;;  %432 = vtanh.f32 %v201_v47 }
  0xee   :  { %v228_v56 = vadd.f32 1.0, %v427_v52  ;;  %434 = vtanh.f32 %v196_v49 }
  0xef   :  { %436 = vrcp.f32 %v229_v54 }
  0xf0   :  { %438 = vrcp.f32 %v228_v56 }
  0xf1   :  { %440 = vtanh.f32 %v211_v55 }
  0xf2   :  { %442 = vtanh.f32 %v206_v57 }
  0xf5   :  { %v429_v58 = vpop.eup %428 }
  0xf6   :  { %v431_v59 = vpop.eup %430  ;;  %v243_v60 = vsub.f32 1.0, %v429_v58 }
  0xf7   :  { %v433_v61 = vpop.eup %432  ;;  %v242_v62 = vsub.f32 1.0, %v431_v59 }
  0xf8   :  { %v435_v63 = vpop.eup %434  ;;  %v247_v0 = vmul.f32 %v433_v61, %v243_v60 }
  0xf9   :  { %v437_v1 = vpop.eup %436  ;;  %v246_v2 = vmul.f32 %v435_v63, %v242_v62 }
  0xfa   :  { %v439_v3 = vpop.eup %438  ;;  %v245_v4 = vsub.f32 1.0, %v437_v1  ;;  %v251_v5 = vmax.f32 %v247_v0, 0.0 }
  0xfb   :  { %v441_v6 = vpop.eup %440  ;;  %v244_v7 = vsub.f32 1.0, %v439_v3  ;;  %v250_v8 = vmax.f32 %v246_v2, 0.0 }
  0xfc   :  { %v443_v9 = vpop.eup %442  ;;  %v249_v10 = vmul.f32 %v441_v6, %v245_v4 }
  0xfd   :  { %v408_v11 = vpack.c.bf16 %v251_v5, %v250_v8  ;;  %v248_v12 = vmul.f32 %v443_v9, %v244_v7 }
  0xfe   :  { %v253_v13 = vmax.f32 %v249_v10, 0.0 }
  0xff   :  { %409 = vmatpush3.bf16.msra.mxu1 %v408_v11  ;;  %v252_v14 = vmax.f32 %v248_v12, 0.0 }
 0x100   :  { %410 = vmatprep.subr.bf16.mxu1 %v469_v20 }
 0x101   :  { %v411_v15 = vpack.c.bf16 %v253_v13, %v252_v14 }
 0x103   :  { %412 = vmatpush3.bf16.msra.mxu1 %v411_v15 }
 0x106   :  { %405 = vmatmul.mubr.msk.f32.vlgmr.msra.gmra.mrb[0].mxu1 %vm265_vm3, %v254_v16 }
 0x1d9   :  { %v335_v23 = vpop.f32.mrb[0].mxu1 }
 0x1da   :  { %v336_v24 = vadd.f32 %v335_v23, %v264_v22  ;;  %v406_v25 = vpop.f32.mrb[1].mxu1 }
 0x1dc   :  { %339 = vst [vmem:[#allocation3] sm:$0x1] %v336_v24 }
 0x1dd   :  { %455 = shalt.err (!%p452_p4)
}
 0x1de   :  { %s456_s30 = scalar_lea.hbm %s587_s5, 16 }
 0x1df   :  { %p457_p5 = scmp.ne.s32.totalorder %s587_s5, %s456_s30  ;;  %p460_p6 = scmp.lt.u32.totalorder %s456_s30, %s587_s5 }
 0x1e1   :  { %p462_p7 = pnand %p460_p6, %p457_p5 }
 0x1e3   :  { %465 = shalt.err (!%p462_p7)
}
 0x1e4   :  { %349 = dma.vmem_to_hbm [thread:$0]  %s347_s0, 16, %s587_s5, [#allocation4]  }
 0x1e5   :  { %466 = dma.done.wait [#allocation4], 16  }
 0x1e6   :  { %467 = vsyncadd [#allocation4], 4294967280 }
 0x1e7   :  { %353 = vsyncpa [#allocation4], 1 }

</bundles_post_ra>
